<compile_context>
chip_gen: v7x
topology: tpu7x:2x2x1
jax: 0.10.0
libtpu: 0.0.40
codegen_flags: <defaults>
</compile_context>

<pallas_src>
import functools

import jax
import jax.numpy as jnp
from jax import lax
from jax.experimental import pallas as pl
from jax.experimental.pallas import tpu as pltpu


# ---------------------------------------------------------------------------
# Kernel bodies
# ---------------------------------------------------------------------------

def _scaled_logits(anchor_ref, contrast_t_ref, inv_temperature):
    """(tm, n) f32 logits, already divided by temperature.

    1/T is folded into the (tm, D) anchor tile (D << N -> ~N/D fewer VPU muls than
    scaling the (tm, N) logits); the contrast panel arrives pre-transposed (D, N),
    so the dot is the canonical (M,K)x(K,N) MXU contraction.
    """
    a = anchor_ref[...]
    a = a * jnp.asarray(inv_temperature, dtype=a.dtype)
    return lax.dot_general(
        a, contrast_t_ref[...],
        dimension_numbers=(((1,), (0,)), ((), ())),
        preferred_element_type=jnp.float32)


def _finalize_tile(mlpp, global_rows, n_anchor, out_ref):
    # Drop rows past n_anchor (grid padding on the last tile); jnp.where contains
    # any NaN/inf produced by padded (undefined) anchor rows.
    row_valid = global_rows < n_anchor
    tile_sum = jnp.sum(jnp.where(row_valid, mlpp, 0.0))
    out_ref[...] = jnp.full(out_ref.shape, tile_sum, dtype=jnp.float32)


def _supcon_label_kernel(a_lab_ref, c_lab_ref, col_ids_ref, npos_ref,
                         anchor_ref, contrast_t_ref, out_ref,
                         *, inv_temperature, n_anchor, block_m):
    # a_lab_ref:      (block_m, 1) int32  anchor labels (streamed)
    # c_lab_ref:      (1, n)       int32  contrast labels (resident)
    # col_ids_ref:    (1, n)       int32  contrast column ids (resident)
    # npos_ref:       (block_m, 1) f32    precomputed positive counts (streamed)
    # anchor_ref:     (block_m, d)        anchor feature tile (native dtype)
    # contrast_t_ref: (d, n)              pre-transposed contrast panel (resident)
    # out_ref:        (1, 8, 128)  f32    lane-dense per-tile partial sum
    i = pl.program_id(0)
    logits = _scaled_logits(anchor_ref, contrast_t_ref, inv_temperature)

    row_max = jnp.max(logits, axis=1, keepdims=True)   # over full row (incl. self), as in torch
    stab = logits - row_max

    global_rows = i * block_m + lax.broadcasted_iota(jnp.int32, (block_m, 1), 0)
    not_self = col_ids_ref[...] != global_rows          # self-exclusion: 1 cmp / element
    label_eq = a_lab_ref[...] == c_lab_ref[...]         # positives:      1 cmp / element
    pos_mask = jnp.logical_and(label_eq, not_self)

    # Denominator stays a masked sum (NOT sum(exp) - exp(self)): the self term
    # typically dominates and the subtraction form cancels catastrophically.
    exp_stab = jnp.exp(stab)
    denom = jnp.sum(jnp.where(not_self, exp_stab, 0.0), axis=1, keepdims=True)
    log_denom = jnp.log(denom)
    pos_dot = jnp.sum(jnp.where(pos_mask, stab, 0.0), axis=1, keepdims=True)

    n_pos = npos_ref[...]                                # precomputed in the wrapper
    n_pos_safe = jnp.where(n_pos < 1e-6, 1.0, n_pos)
    # sum_j pmask * log_prob == pos_dot - n_pos * log_denom  (no (tm, n) log_prob tile)
    mlpp = (pos_dot - n_pos * log_denom) / n_pos_safe

    _finalize_tile(mlpp, global_rows, n_anchor, out_ref)


def _supcon_mask_kernel(col_ids_ref, npos_ref, anchor_ref, contrast_t_ref,
                        mask_ref, out_ref, *, inv_temperature, n_anchor, block_m):
    # Explicit `mask=` API path: mask_ref is a (block_m, n) tile of the tiled mask,
    # kept f32 so weighted / asymmetric masks retain their semantics.
    i = pl.program_id(0)
    logits = _scaled_logits(anchor_ref, contrast_t_ref, inv_temperature)

    row_max = jnp.max(logits, axis=1, keepdims=True)
    stab = logits - row_max

    global_rows = i * block_m + lax.broadcasted_iota(jnp.int32, (block_m, 1), 0)
    not_self = col_ids_ref[...] != global_rows

    exp_stab = jnp.exp(stab)
    denom = jnp.sum(jnp.where(not_self, exp_stab, 0.0), axis=1, keepdims=True)
    log_denom = jnp.log(denom)

    m = jnp.where(not_self, mask_ref[...], 0.0)          # self-excluded mask weights
    pos_dot = jnp.sum(m * stab, axis=1, keepdims=True)

    n_pos = npos_ref[...]
    n_pos_safe = jnp.where(n_pos < 1e-6, 1.0, n_pos)
    mlpp = (pos_dot - n_pos * log_denom) / n_pos_safe

    _finalize_tile(mlpp, global_rows, n_anchor, out_ref)


# ---------------------------------------------------------------------------
# Wrapper helpers
# ---------------------------------------------------------------------------

def _vmem_budget():
    """Generation-aware VMEM budgets: (tiling_budget, vmem_limit_bytes)."""
    cap = None
    try:
        info = pltpu.get_tpu_info()
        for name in ("vmem_capacity_bytes", "vmem_size_bytes", "vmem_bytes"):
            val = getattr(info, name, None)
            if val:
                cap = int(val)
                break
    except Exception:
        cap = None
    if cap is None:
        cap = 64 << 20                       # conservative: smallest per-TC VMEM (v7x)
    if cap >= (96 << 20):                    # v5e / v6e: 128 MiB physical VMEM
        return 100 << 20, 110 << 20
    return 40 << 20, 48 << 20                # v7x: 64 MiB per TensorCore


def _choose_block_m(n_anchor, n_contrast, dim, feat_bytes, has_mask, budget):
    """Largest MXU-friendly anchor-row tile that fits the per-generation budget."""
    # Resident blocks (contrast panel + contrast labels + column ids).  Counted at
    # 2x: Pallas double-buffers by default; Buffered(1) halves this but we budget
    # for the fallback path so both variants fit.
    resident = 2 * (n_contrast * dim * feat_bytes + 2 * n_contrast * 4)

    def fits(tm):
        per_tile = (2 * tm * dim * feat_bytes       # anchor tile, double-buffered
                    + 2 * 2 * tm * 4                # per-row label / n_pos vectors
                    + 5 * tm * n_contrast * 4)      # live (tm, n) f32 temporaries
        if has_mask:
            per_tile += 2 * tm * n_contrast * 4     # streamed mask tile, double-buffered
        return resident + per_tile <= budget

    # Multiples of 128 keep the MXU M-dim full (especially v5e's 4x 128x128 MXU).
    for tm in (2048, 1024, 512, 384, 256, 128):
        if tm <= n_anchor and fits(tm):
            return tm
    if n_anchor <= 128:
        return n_anchor                              # single tile == full dim
    # TODO(synk): column tiling (online softmax over contrast columns) would keep
    #             block_m >= 128 here; fall back to small MXU-unfriendly tiles.
    for tm in (64, 32, 16, 8):
        if fits(tm):
            return tm
    return 8


# ---------------------------------------------------------------------------
# Public wrapper
# ---------------------------------------------------------------------------

def supcon_loss(features, labels=None, mask=None, *, temperature=0.07,
                contrast_mode="all", base_temperature=0.07):
    """JAX/Pallas equivalent of SupConLoss.forward.

    features: [bsz, n_views, ...] (flattened to [bsz, n_views, dim]).  Pass bf16
              features for 2x less HBM/VMEM traffic; the MXU accumulates in f32.
    labels:   optional [bsz] int labels.
    mask:     optional [bsz, bsz] mask (mutually exclusive with labels).
    """
    if features.ndim < 3:
        raise ValueError("`features` needs to be [bsz, n_views, ...]")
    if features.ndim > 3:
        features = features.reshape(features.shape[0], features.shape[1], -1)
    bsz, n_views, dim = features.shape
    if labels is not None and mask is not None:
        raise ValueError("Cannot define both `labels` and `mask`")

    contrast_count = n_views
    # torch.cat(torch.unbind(features, dim=1), dim=0): view-major stacking -> [N, D]
    contrast_feature = jnp.swapaxes(features, 0, 1).reshape(bsz * n_views, dim)

    if contrast_mode == "one":
        anchor_feature = features[:, 0]
        anchor_count = 1
    elif contrast_mode == "all":
        anchor_feature = contrast_feature
        anchor_count = contrast_count
    else:
        raise ValueError(f"Unknown mode: {contrast_mode}")

    n_contrast = bsz * contrast_count
    n_anchor = bsz * anchor_count

    # One-time wrapper transpose -> canonical (M,K)x(K,N) MXU layout in-kernel.
    contrast_t = contrast_feature.T                                   # (D, N)
    col_ids = jnp.arange(n_contrast, dtype=jnp.int32).reshape(1, n_contrast)

    feat_bytes = jnp.dtype(features.dtype).itemsize
    budget, vmem_limit = _vmem_budget()
    block_m = _choose_block_m(n_anchor, n_contrast, dim, feat_bytes,
                              has_mask=mask is not None, budget=budget)
    num_tiles = pl.cdiv(n_anchor, block_m)

    # Lane-dense per-tile partial sums -> unmasked stores; tiny final mean in JAX.
    out_shape = jax.ShapeDtypeStruct((num_tiles, 8, 128), jnp.float32)
    out_spec = pl.BlockSpec((1, 8, 128), lambda i: (i, 0, 0))

    mask_bytes = 0 if mask is None else n_anchor * n_contrast * 4
    cost = pl.CostEstimate(
        flops=2 * n_anchor * n_contrast * dim + 8 * n_anchor * n_contrast,
        transcendentals=n_anchor * n_contrast + n_anchor,
        bytes_accessed=((n_anchor + n_contrast) * dim * feat_bytes
                        + 4 * (2 * n_anchor + 2 * n_contrast)
                        + mask_bytes + num_tiles * 8 * 128 * 4))
    compiler_params = pltpu.CompilerParams(
        dimension_semantics=("parallel",),        # independent row tiles (both TCs on v7x)
        vmem_limit_bytes=vmem_limit)

    inv_t = float(1.0 / temperature)

    def resident_spec(shape, single_buffer):
        idx_map = lambda i: (0,) * len(shape)
        if single_buffer:
            # Constant-index resident blocks don't need double buffering.
            return pl.BlockSpec(shape, idx_map, pipeline_mode=pl.Buffered(1))
        return pl.BlockSpec(shape, idx_map)

    row_spec = pl.BlockSpec((block_m, 1), lambda i: (i, 0))
    anchor_spec = pl.BlockSpec((block_m, dim), lambda i: (i, 0))

    if mask is None:
        # Label path (covers SimCLR labels=None via unique pseudo-labels).
        if labels is None:
            base_labels = jnp.arange(bsz, dtype=jnp.int32)   # eye(bsz) == unique labels
        else:
            labels = jnp.asarray(labels).reshape(-1)
            if labels.shape[0] != bsz:
                raise ValueError("Num of labels does not match num of features")
            base_labels = labels.astype(jnp.int32)
        contrast_labels = jnp.tile(base_labels, contrast_count)              # [N]
        anchor_labels = contrast_labels if contrast_mode == "all" else base_labels
        a_lab = anchor_labels.reshape(n_anchor, 1)
        c_lab = contrast_labels.reshape(1, n_contrast)

        # Positive counts precomputed once (O(bsz^2)) -> one fewer XLU row reduction.
        counts = jnp.sum(base_labels[:, None] == base_labels[None, :], axis=1)
        n_pos_base = (contrast_count * counts - 1).astype(jnp.float32)
        n_pos = jnp.tile(n_pos_base, anchor_count).reshape(n_anchor, 1)

        kernel = functools.partial(_supcon_label_kernel, inv_temperature=inv_t,
                                   n_anchor=n_anchor, block_m=block_m)

        def call(single_buffer):
            return pl.pallas_call(
                kernel, grid=(num_tiles,),
                in_specs=[row_spec,                                        # anchor labels
                          resident_spec((1, n_contrast), single_buffer),   # contrast labels
                          resident_spec((1, n_contrast), single_buffer),   # column ids
                          row_spec,                                        # n_pos
                          anchor_spec,                                     # anchor features
                          resident_spec((dim, n_contrast), single_buffer)],  # contrast panel
                out_specs=out_spec, out_shape=out_shape,
                compiler_params=compiler_params, cost_estimate=cost,
            )(a_lab, c_lab, col_ids, n_pos, anchor_feature, contrast_t)
    else:
        # Explicit-mask API path.
        mask_f = jnp.asarray(mask, dtype=jnp.float32)
        row_sums = jnp.sum(mask_f, axis=1)
        mask_diag = jnp.diagonal(mask_f)
        n_pos_base = contrast_count * row_sums - mask_diag        # exact, self-excluded
        n_pos = jnp.tile(n_pos_base, anchor_count).reshape(n_anchor, 1)
        # TODO(synk): stream the original (bsz, bsz) mask (or an int8 cast) instead
        #             of materializing the tiled f32 [N_a, N] mask in HBM.
        full_mask = jnp.tile(mask_f, (anchor_count, contrast_count))

        kernel = functools.partial(_supcon_mask_kernel, inv_temperature=inv_t,
                                   n_anchor=n_anchor, block_m=block_m)

        def call(single_buffer):
            return pl.pallas_call(
                kernel, grid=(num_tiles,),
                in_specs=[resident_spec((1, n_contrast), single_buffer),   # column ids
                          row_spec,                                        # n_pos
                          anchor_spec,                                     # anchor features
                          resident_spec((dim, n_contrast), single_buffer),  # contrast panel
                          pl.BlockSpec((block_m, n_contrast), lambda i: (i, 0))],  # mask tile
                out_specs=out_spec, out_shape=out_shape,
                compiler_params=compiler_params, cost_estimate=cost,
            )(col_ids, n_pos, anchor_feature, contrast_t, full_mask)

    # Attempt single-buffered resident panel (halves its VMEM footprint, key on
    # v7x); fall back to default double-buffered specs if Buffered(1) is rejected.
    # (This try/except relies on eager execution; under jit the lowering error
    # would surface at compile time outside the try.)
    try:
        partials = call(single_buffer=True)
    except Exception:
        partials = call(single_buffer=False)

    total = jnp.sum(partials[:, 0, 0])
    return -(temperature / base_temperature) * total / n_anchor


# ---------------------------------------------------------------------------
# Pure-JAX reference (mirrors the PyTorch code) for correctness checks
# ---------------------------------------------------------------------------

def _supcon_loss_ref(features, labels=None, mask=None, *, temperature=0.07,
                     contrast_mode="all", base_temperature=0.07):
    bsz, n_views, dim = features.shape
    if labels is None and mask is None:
        mask = jnp.eye(bsz, dtype=jnp.float32)
    elif labels is not None:
        labels = labels.reshape(-1, 1)
        mask = (labels == labels.T).astype(jnp.float32)
    else:
        mask = mask.astype(jnp.float32)
    contrast = jnp.concatenate([features[:, v] for v in range(n_views)], axis=0)
    if contrast_mode == "one":
        anchor = features[:, 0]
        anchor_count = 1
    else:
        anchor = contrast
        anchor_count = n_views
    logits = anchor @ contrast.T / temperature
    logits = logits - jnp.max(logits, axis=1, keepdims=True)
    mask = jnp.tile(mask, (anchor_count, n_views))
    n_a = bsz * anchor_count
    n_c = bsz * n_views
    logits_mask = jnp.ones((n_a, n_c)).at[jnp.arange(n_a), jnp.arange(n_a)].set(0.0)
    mask = mask * logits_mask
    exp_logits = jnp.exp(logits) * logits_mask
    log_prob = logits - jnp.log(exp_logits.sum(1, keepdims=True))
    pos = mask.sum(1)
    pos = jnp.where(pos < 1e-6, 1.0, pos)
    mean_log_prob_pos = (mask * log_prob).sum(1) / pos
    loss = -(temperature / base_temperature) * mean_log_prob_pos
    return loss.mean()


# ---------------------------------------------------------------------------
# Self-test
# ---------------------------------------------------------------------------

if __name__ == "__main__":
    key = jax.random.PRNGKey(0)
    kf, kl = jax.random.split(key)

    # Small case (single row tile).
    bsz, n_views, dim = 4, 2, 128
    features = jax.random.normal(kf, (bsz, n_views, dim), dtype=jnp.float32)
    features = features / jnp.linalg.norm(features, axis=-1, keepdims=True)
    labels = jax.random.randint(kl, (bsz,), 0, 2)

    loss = jax.block_until_ready(supcon_loss(features, labels=labels))
    ref = _supcon_loss_ref(features, labels=labels)
    assert jnp.allclose(loss, ref, rtol=1e-4, atol=1e-5), (loss, ref)

    # SimCLR (labels=None) path.
    loss_u = jax.block_until_ready(supcon_loss(features))
    ref_u = _supcon_loss_ref(features)
    assert jnp.allclose(loss_u, ref_u, rtol=1e-4, atol=1e-5), (loss_u, ref_u)

    # Explicit `mask=` API path.
    emask = (labels.reshape(-1, 1) == labels.reshape(1, -1)).astype(jnp.float32)
    loss_m = jax.block_until_ready(supcon_loss(features, mask=emask))
    assert jnp.allclose(loss_m, ref, rtol=1e-4, atol=1e-5), (loss_m, ref)

    # contrast_mode="one".
    loss_one = jax.block_until_ready(
        supcon_loss(features, labels=labels, contrast_mode="one"))
    ref_one = _supcon_loss_ref(features, labels=labels, contrast_mode="one")
    assert jnp.allclose(loss_one, ref_one, rtol=1e-4, atol=1e-5), (loss_one, ref_one)

    # Multi-tile case exercising row tiling + padded last tile (N_a=320, TM=256).
    kf2, kl2 = jax.random.split(jax.random.PRNGKey(1))
    bsz2 = 160
    f2 = jax.random.normal(kf2, (bsz2, n_views, dim), dtype=jnp.float32)
    f2 = f2 / jnp.linalg.norm(f2, axis=-1, keepdims=True)
    l2 = jax.random.randint(kl2, (bsz2,), 0, 4)
    loss2 = jax.block_until_ready(supcon_loss(f2, labels=l2))
    ref2 = _supcon_loss_ref(f2, labels=l2)
    assert jnp.allclose(loss2, ref2, rtol=1e-4, atol=1e-5), (loss2, ref2)

    print("KERNEL_OK")
</pallas_src>

<mosaic_0001>
module attributes {stable_mosaic.version = 11 : i64} {
  func.func @_supcon_label_kernel(%arg0: i32, %arg1: memref<8x1xi32, #tpu.memory_space<vmem>>, %arg2: memref<1x8xi32, #tpu.memory_space<vmem>>, %arg3: memref<1x8xi32, #tpu.memory_space<vmem>>, %arg4: memref<8x1xf32, #tpu.memory_space<vmem>>, %arg5: memref<8x128xf32, #tpu.memory_space<vmem>>, %arg6: memref<128x8xf32, #tpu.memory_space<vmem>>, %arg7: memref<1x8x128xf32, #tpu.memory_space<vmem>>) attributes {dimension_semantics = [#tpu.dimension_semantics<parallel>], iteration_bounds = array<i64: 1>, scalar_prefetch = 0 : i64, scratch_operands = 0 : i64, tpu.core_type = #tpu.core_type<tc>, window_params = [{transform_indices = @transform_0, window_bounds = array<i64: 8, 1>}, {pipeline_mode = #tpu.pipeline_mode<synchronous>, transform_indices = @transform_1, window_bounds = array<i64: 1, 8>}, {pipeline_mode = #tpu.pipeline_mode<synchronous>, transform_indices = @transform_2, window_bounds = array<i64: 1, 8>}, {transform_indices = @transform_3, window_bounds = array<i64: 8, 1>}, {transform_indices = @transform_4, window_bounds = array<i64: 8, 128>}, {pipeline_mode = #tpu.pipeline_mode<synchronous>, transform_indices = @transform_5, window_bounds = array<i64: 128, 8>}, {transform_indices = @transform_6, window_bounds = array<i64: 1, 8, 128>}]} {
    %c0 = arith.constant 0 : index
    %c0_0 = arith.constant 0 : index
    %0 = vector.load %arg5[%c0, %c0_0] : memref<8x128xf32, #tpu.memory_space<vmem>>, vector<8x128xf32>
    %cst = arith.constant 14.2857141 : f32
    %1 = vector.broadcast %cst : f32 to vector<8x128xf32>
    %2 = arith.mulf %0, %1 : vector<8x128xf32>
    %c0_1 = arith.constant 0 : index
    %c0_2 = arith.constant 0 : index
    %3 = vector.load %arg6[%c0_1, %c0_2] : memref<128x8xf32, #tpu.memory_space<vmem>>, vector<128x8xf32>
    %cst_3 = arith.constant dense<0.000000e+00> : vector<8x8xf32>
    %4 = tpu.matmul %2, %3, %cst_3 {dimension_numbers = #tpu.dot_dimension_numbers<[1], [0], [0], [1], [0, 0, 1, 1], [], []>} : vector<8x128xf32>, vector<128x8xf32>, vector<8x8xf32> -> vector<8x8xf32>
    %cst_4 = arith.constant dense<0xFF800000> : vector<8xf32>
    %5 = vector.multi_reduction <maximumf>, %4, %cst_4 [1] : vector<8x8xf32> to vector<8xf32>
    %6 = vector.shape_cast %5 : vector<8xf32> to vector<8x1xf32>
    %7 = vector.broadcast %6 : vector<8x1xf32> to vector<8x8xf32>
    %8 = arith.subf %4, %7 : vector<8x8xf32>
    %c8_i32 = arith.constant 8 : i32
    %9 = arith.muli %arg0, %c8_i32 : i32
    %10 = tpu.iota {dimensions = array<i32: 0>} : vector<8x1xi32>
    %11 = vector.broadcast %9 : i32 to vector<8x1xi32>
    %12 = arith.addi %11, %10 : vector<8x1xi32>
    %c0_5 = arith.constant 0 : index
    %c0_6 = arith.constant 0 : index
    %13 = vector.load %arg3[%c0_5, %c0_6] : memref<1x8xi32, #tpu.memory_space<vmem>>, vector<1x8xi32>
    %14 = vector.broadcast %13 : vector<1x8xi32> to vector<8x8xi32>
    %15 = vector.broadcast %12 : vector<8x1xi32> to vector<8x8xi32>
    %16 = arith.cmpi ne, %14, %15 : vector<8x8xi32>
    %c0_7 = arith.constant 0 : index
    %c0_8 = arith.constant 0 : index
    %17 = vector.load %arg1[%c0_7, %c0_8] : memref<8x1xi32, #tpu.memory_space<vmem>>, vector<8x1xi32>
    %c0_9 = arith.constant 0 : index
    %c0_10 = arith.constant 0 : index
    %18 = vector.load %arg2[%c0_9, %c0_10] : memref<1x8xi32, #tpu.memory_space<vmem>>, vector<1x8xi32>
    %19 = vector.broadcast %17 : vector<8x1xi32> to vector<8x8xi32>
    %20 = vector.broadcast %18 : vector<1x8xi32> to vector<8x8xi32>
    %21 = arith.cmpi eq, %19, %20 : vector<8x8xi32>
    %22 = arith.andi %21, %16 : vector<8x8xi1>
    %23 = math.exp %8 : vector<8x8xf32>
    %cst_11 = arith.constant 0.000000e+00 : f32
    %24 = vector.broadcast %cst_11 : f32 to vector<8x8xf32>
    %25 = arith.select %16, %23, %24 : vector<8x8xi1>, vector<8x8xf32>
    %cst_12 = arith.constant dense<0.000000e+00> : vector<8xf32>
    %26 = vector.multi_reduction <add>, %25, %cst_12 [1] : vector<8x8xf32> to vector<8xf32>
    %27 = vector.shape_cast %26 : vector<8xf32> to vector<8x1xf32>
    %28 = math.log %27 : vector<8x1xf32>
    %cst_13 = arith.constant 0.000000e+00 : f32
    %29 = vector.broadcast %cst_13 : f32 to vector<8x8xf32>
    %30 = arith.select %22, %8, %29 : vector<8x8xi1>, vector<8x8xf32>
    %cst_14 = arith.constant dense<0.000000e+00> : vector<8xf32>
    %31 = vector.multi_reduction <add>, %30, %cst_14 [1] : vector<8x8xf32> to vector<8xf32>
    %32 = vector.shape_cast %31 : vector<8xf32> to vector<8x1xf32>
    %c0_15 = arith.constant 0 : index
    %c0_16 = arith.constant 0 : index
    %33 = vector.load %arg4[%c0_15, %c0_16] : memref<8x1xf32, #tpu.memory_space<vmem>>, vector<8x1xf32>
    %cst_17 = arith.constant 9.99999997E-7 : f32
    %34 = vector.broadcast %cst_17 : f32 to vector<8x1xf32>
    %35 = arith.cmpf olt, %33, %34 : vector<8x1xf32>
    %cst_18 = arith.constant 1.000000e+00 : f32
    %36 = vector.broadcast %cst_18 : f32 to vector<8x1xf32>
    %37 = arith.select %35, %36, %33 : vector<8x1xi1>, vector<8x1xf32>
    %38 = arith.mulf %33, %28 : vector<8x1xf32>
    %39 = arith.subf %32, %38 : vector<8x1xf32>
    %40 = arith.divf %39, %37 : vector<8x1xf32>
    %c8_i32_19 = arith.constant 8 : i32
    %41 = vector.broadcast %c8_i32_19 : i32 to vector<8x1xi32>
    %42 = arith.cmpi slt, %12, %41 : vector<8x1xi32>
    %cst_20 = arith.constant 0.000000e+00 : f32
    %43 = vector.broadcast %cst_20 : f32 to vector<8x1xf32>
    %44 = arith.select %42, %40, %43 : vector<8x1xi1>, vector<8x1xf32>
    %45 = vector.shape_cast %44 : vector<8x1xf32> to vector<1x8x1xf32>
    %cst_21 = arith.constant dense<0.000000e+00> : vector<1xf32>
    %46 = vector.multi_reduction <add>, %45, %cst_21 [1, 2] : vector<1x8x1xf32> to vector<1xf32>
    %47 = vector.shape_cast %46 : vector<1xf32> to vector<1x1x1xf32>
    %48 = vector.extract %47[0, 0, 0] : f32 from vector<1x1x1xf32>
    %49 = vector.broadcast %48 : f32 to vector<1x8x128xf32>
    %c0_22 = arith.constant 0 : index
    %c0_23 = arith.constant 0 : index
    %c0_24 = arith.constant 0 : index
    %50 = vector.load %arg7[%c0_22, %c0_23, %c0_24] : memref<1x8x128xf32, #tpu.memory_space<vmem>>, vector<1x8x128xf32>
    tpu.vector_store %arg7[%c0_22, %c0_23, %c0_24], %49 {strides = array<i32>} : memref<1x8x128xf32, #tpu.memory_space<vmem>>, vector<1x8x128xf32>,
    return
  }
  func.func @transform_0(%arg0: i32) -> (i32, i32) {
    %c0_i32 = arith.constant 0 : i32
    %c0_i32_0 = arith.constant 0 : i32
    return %arg0, %c0_i32 : i32, i32
  }
  func.func @transform_1(%arg0: i32) -> (i32, i32) {
    %c0_i32 = arith.constant 0 : i32
    %c0_i32_0 = arith.constant 0 : i32
    %c0_i32_1 = arith.constant 0 : i32
    return %c0_i32, %c0_i32_0 : i32, i32
  }
  func.func @transform_2(%arg0: i32) -> (i32, i32) {
    %c0_i32 = arith.constant 0 : i32
    %c0_i32_0 = arith.constant 0 : i32
    %c0_i32_1 = arith.constant 0 : i32
    return %c0_i32, %c0_i32_0 : i32, i32
  }
  func.func @transform_3(%arg0: i32) -> (i32, i32) {
    %c0_i32 = arith.constant 0 : i32
    %c0_i32_0 = arith.constant 0 : i32
    return %arg0, %c0_i32 : i32, i32
  }
  func.func @transform_4(%arg0: i32) -> (i32, i32) {
    %c0_i32 = arith.constant 0 : i32
    %c0_i32_0 = arith.constant 0 : i32
    return %arg0, %c0_i32 : i32, i32
  }
  func.func @transform_5(%arg0: i32) -> (i32, i32) {
    %c0_i32 = arith.constant 0 : i32
    %c0_i32_0 = arith.constant 0 : i32
    %c0_i32_1 = arith.constant 0 : i32
    return %c0_i32, %c0_i32_0 : i32, i32
  }
  func.func @transform_6(%arg0: i32) -> (i32, i32, i32) {
    %c0_i32 = arith.constant 0 : i32
    %c0_i32_0 = arith.constant 0 : i32
    %c0_i32_1 = arith.constant 0 : i32
    return %arg0, %c0_i32, %c0_i32_0 : i32, i32, i32
  }
}

module attributes {stable_mosaic.version = 11 : i64} {
  func.func @_supcon_label_kernel(%arg0: i32, %arg1: memref<8x1xi32, #tpu.memory_space<vmem>>, %arg2: memref<1x8xi32, #tpu.memory_space<vmem>>, %arg3: memref<1x8xi32, #tpu.memory_space<vmem>>, %arg4: memref<8x1xf32, #tpu.memory_space<vmem>>, %arg5: memref<8x128xf32, #tpu.memory_space<vmem>>, %arg6: memref<128x8xf32, #tpu.memory_space<vmem>>, %arg7: memref<1x8x128xf32, #tpu.memory_space<vmem>>) attributes {dimension_semantics = [#tpu.dimension_semantics<parallel>], iteration_bounds = array<i64: 1>, scalar_prefetch = 0 : i64, scratch_operands = 0 : i64, tpu.core_type = #tpu.core_type<tc>, window_params = [{transform_indices = @transform_0, window_bounds = array<i64: 8, 1>}, {pipeline_mode = #tpu.pipeline_mode<synchronous>, transform_indices = @transform_1, window_bounds = array<i64: 1, 8>}, {pipeline_mode = #tpu.pipeline_mode<synchronous>, transform_indices = @transform_2, window_bounds = array<i64: 1, 8>}, {transform_indices = @transform_3, window_bounds = array<i64: 8, 1>}, {transform_indices = @transform_4, window_bounds = array<i64: 8, 128>}, {pipeline_mode = #tpu.pipeline_mode<synchronous>, transform_indices = @transform_5, window_bounds = array<i64: 128, 8>}, {transform_indices = @transform_6, window_bounds = array<i64: 1, 8, 128>}]} {
    %c0 = arith.constant 0 : index
    %c0_0 = arith.constant 0 : index
    %0 = vector.load %arg5[%c0, %c0_0] : memref<8x128xf32, #tpu.memory_space<vmem>>, vector<8x128xf32>
    %cst = arith.constant 14.2857141 : f32
    %1 = vector.broadcast %cst : f32 to vector<8x128xf32>
    %2 = arith.mulf %0, %1 : vector<8x128xf32>
    %c0_1 = arith.constant 0 : index
    %c0_2 = arith.constant 0 : index
    %3 = vector.load %arg6[%c0_1, %c0_2] : memref<128x8xf32, #tpu.memory_space<vmem>>, vector<128x8xf32>
    %cst_3 = arith.constant dense<0.000000e+00> : vector<8x8xf32>
    %4 = tpu.matmul %2, %3, %cst_3 {dimension_numbers = #tpu.dot_dimension_numbers<[1], [0], [0], [1], [0, 0, 1, 1], [], []>} : vector<8x128xf32>, vector<128x8xf32>, vector<8x8xf32> -> vector<8x8xf32>
    %cst_4 = arith.constant dense<0xFF800000> : vector<8xf32>
    %5 = vector.multi_reduction <maximumf>, %4, %cst_4 [1] : vector<8x8xf32> to vector<8xf32>
    %6 = vector.shape_cast %5 : vector<8xf32> to vector<8x1xf32>
    %7 = vector.broadcast %6 : vector<8x1xf32> to vector<8x8xf32>
    %8 = arith.subf %4, %7 : vector<8x8xf32>
    %c8_i32 = arith.constant 8 : i32
    %9 = arith.muli %arg0, %c8_i32 : i32
    %10 = tpu.iota {dimensions = array<i32: 0>} : vector<8x1xi32>
    %11 = vector.broadcast %9 : i32 to vector<8x1xi32>
    %12 = arith.addi %11, %10 : vector<8x1xi32>
    %c0_5 = arith.constant 0 : index
    %c0_6 = arith.constant 0 : index
    %13 = vector.load %arg3[%c0_5, %c0_6] : memref<1x8xi32, #tpu.memory_space<vmem>>, vector<1x8xi32>
    %14 = vector.broadcast %13 : vector<1x8xi32> to vector<8x8xi32>
    %15 = vector.broadcast %12 : vector<8x1xi32> to vector<8x8xi32>
    %16 = arith.cmpi ne, %14, %15 : vector<8x8xi32>
    %c0_7 = arith.constant 0 : index
    %c0_8 = arith.constant 0 : index
    %17 = vector.load %arg1[%c0_7, %c0_8] : memref<8x1xi32, #tpu.memory_space<vmem>>, vector<8x1xi32>
    %c0_9 = arith.constant 0 : index
    %c0_10 = arith.constant 0 : index
    %18 = vector.load %arg2[%c0_9, %c0_10] : memref<1x8xi32, #tpu.memory_space<vmem>>, vector<1x8xi32>
    %19 = vector.broadcast %17 : vector<8x1xi32> to vector<8x8xi32>
    %20 = vector.broadcast %18 : vector<1x8xi32> to vector<8x8xi32>
    %21 = arith.cmpi eq, %19, %20 : vector<8x8xi32>
    %22 = arith.andi %21, %16 : vector<8x8xi1>
    %23 = math.exp %8 : vector<8x8xf32>
    %cst_11 = arith.constant 0.000000e+00 : f32
    %24 = vector.broadcast %cst_11 : f32 to vector<8x8xf32>
    %25 = arith.select %16, %23, %24 : vector<8x8xi1>, vector<8x8xf32>
    %cst_12 = arith.constant dense<0.000000e+00> : vector<8xf32>
    %26 = vector.multi_reduction <add>, %25, %cst_12 [1] : vector<8x8xf32> to vector<8xf32>
    %27 = vector.shape_cast %26 : vector<8xf32> to vector<8x1xf32>
    %28 = math.log %27 : vector<8x1xf32>
    %cst_13 = arith.constant 0.000000e+00 : f32
    %29 = vector.broadcast %cst_13 : f32 to vector<8x8xf32>
    %30 = arith.select %22, %8, %29 : vector<8x8xi1>, vector<8x8xf32>
    %cst_14 = arith.constant dense<0.000000e+00> : vector<8xf32>
    %31 = vector.multi_reduction <add>, %30, %cst_14 [1] : vector<8x8xf32> to vector<8xf32>
    %32 = vector.shape_cast %31 : vector<8xf32> to vector<8x1xf32>
    %c0_15 = arith.constant 0 : index
    %c0_16 = arith.constant 0 : index
    %33 = vector.load %arg4[%c0_15, %c0_16] : memref<8x1xf32, #tpu.memory_space<vmem>>, vector<8x1xf32>
    %cst_17 = arith.constant 9.99999997E-7 : f32
    %34 = vector.broadcast %cst_17 : f32 to vector<8x1xf32>
    %35 = arith.cmpf olt, %33, %34 : vector<8x1xf32>
    %cst_18 = arith.constant 1.000000e+00 : f32
    %36 = vector.broadcast %cst_18 : f32 to vector<8x1xf32>
    %37 = arith.select %35, %36, %33 : vector<8x1xi1>, vector<8x1xf32>
    %38 = arith.mulf %33, %28 : vector<8x1xf32>
    %39 = arith.subf %32, %38 : vector<8x1xf32>
    %40 = arith.divf %39, %37 : vector<8x1xf32>
    %c8_i32_19 = arith.constant 8 : i32
    %41 = vector.broadcast %c8_i32_19 : i32 to vector<8x1xi32>
    %42 = arith.cmpi slt, %12, %41 : vector<8x1xi32>
    %cst_20 = arith.constant 0.000000e+00 : f32
    %43 = vector.broadcast %cst_20 : f32 to vector<8x1xf32>
    %44 = arith.select %42, %40, %43 : vector<8x1xi1>, vector<8x1xf32>
    %45 = vector.shape_cast %44 : vector<8x1xf32> to vector<1x8x1xf32>
    %cst_21 = arith.constant dense<0.000000e+00> : vector<1xf32>
    %46 = vector.multi_reduction <add>, %45, %cst_21 [1, 2] : vector<1x8x1xf32> to vector<1xf32>
    %47 = vector.shape_cast %46 : vector<1xf32> to vector<1x1x1xf32>
    %48 = vector.extract %47[0, 0, 0] : f32 from vector<1x1x1xf32>
    %49 = vector.broadcast %48 : f32 to vector<1x8x128xf32>
    %c0_22 = arith.constant 0 : index
    %c0_23 = arith.constant 0 : index
    %c0_24 = arith.constant 0 : index
    %50 = vector.load %arg7[%c0_22, %c0_23, %c0_24] : memref<1x8x128xf32, #tpu.memory_space<vmem>>, vector<1x8x128xf32>
    tpu.vector_store %arg7[%c0_22, %c0_23, %c0_24], %49 {strides = array<i32>} : memref<1x8x128xf32, #tpu.memory_space<vmem>>, vector<1x8x128xf32>,
    return
  }
  func.func @transform_0(%arg0: i32) -> (i32, i32) {
    %c0_i32 = arith.constant 0 : i32
    %c0_i32_0 = arith.constant 0 : i32
    return %arg0, %c0_i32 : i32, i32
  }
  func.func @transform_1(%arg0: i32) -> (i32, i32) {
    %c0_i32 = arith.constant 0 : i32
    %c0_i32_0 = arith.constant 0 : i32
    %c0_i32_1 = arith.constant 0 : i32
    return %c0_i32, %c0_i32_0 : i32, i32
  }
  func.func @transform_2(%arg0: i32) -> (i32, i32) {
    %c0_i32 = arith.constant 0 : i32
    %c0_i32_0 = arith.constant 0 : i32
    %c0_i32_1 = arith.constant 0 : i32
    return %c0_i32, %c0_i32_0 : i32, i32
  }
  func.func @transform_3(%arg0: i32) -> (i32, i32) {
    %c0_i32 = arith.constant 0 : i32
    %c0_i32_0 = arith.constant 0 : i32
    return %arg0, %c0_i32 : i32, i32
  }
  func.func @transform_4(%arg0: i32) -> (i32, i32) {
    %c0_i32 = arith.constant 0 : i32
    %c0_i32_0 = arith.constant 0 : i32
    return %arg0, %c0_i32 : i32, i32
  }
  func.func @transform_5(%arg0: i32) -> (i32, i32) {
    %c0_i32 = arith.constant 0 : i32
    %c0_i32_0 = arith.constant 0 : i32
    %c0_i32_1 = arith.constant 0 : i32
    return %c0_i32, %c0_i32_0 : i32, i32
  }
  func.func @transform_6(%arg0: i32) -> (i32, i32, i32) {
    %c0_i32 = arith.constant 0 : i32
    %c0_i32_0 = arith.constant 0 : i32
    %c0_i32_1 = arith.constant 0 : i32
    return %arg0, %c0_i32, %c0_i32_0 : i32, i32, i32
  }
}

</mosaic_0001>

<bundles_post_ra>
// kernel: tpu_custom_call.1
= control target key start
LH: loop header
LB: loop body
LE: loop exit
PB: predicated region body
PF: predicated region fallthrough
CT: control target
= control target key end

     0   :  { %v303_v3 = vmov 0.0|0.0   ;;  %vm304_vm0 = vmmov 0   ;;  %v305_v6 = vmov 0.0   ;;  %s421_s0 = inlined_call_operand.vmem [shape: s32[8,1], index: 0, kind: input, shape index: {}]   ;;  %s422_s1 = inlined_call_operand.vmem [shape: s32[1,8], index: 1, kind: input, shape index: {}]   ;;  %s423_s2 = inlined_call_operand.vmem [shape: s32[1,8], index: 2, kind: input, shape index: {}]   ;;  %s424_s3 = inlined_call_operand.vmem [shape: f32[8,1], index: 3, kind: input, shape index: {}]   ;;  %s425_s4 = inlined_call_operand.vmem [shape: f32[8,128], index: 4, kind: input, shape index: {}]   ;;  %s426_s5 = inlined_call_operand.vmem [shape: f32[128,8], index: 5, kind: input, shape index: {}]   ;;  %s427_s6 = inlined_call_operand.hbm [shape: f32[1,8,128], index: 6, kind: output, shape index: {}]  }
   0x1   :  { %v26_v0 = vld [vmem:[%s426_s5] sm:$0xff]  ;;  %v27_v1 = vld [vmem:[%s426_s5 + $0x8] sm:$0xff]  ;;  %v28_v2 = vld [vmem:[%s426_s5 + $0x10] sm:$0xff]  ;;  %241 = vmatprep.subr.bf16.mxu0 %v303_v3  ;;  %238 = vmatprep.mubr.msk.f32.mxu0 %vm304_vm0, %v305_v6 }
   0x2   :  { %v242_v4 = vpack.c.bf16 %v27_v1, %v26_v0  ;;  %v29_v5 = vld [vmem:[%s426_s5 + $0x18] sm:$0xff]  ;;  %v30_v8 = vld [vmem:[%s426_s5 + $0x20] sm:$0xff]  ;;  %v31_v9 = vld [vmem:[%s426_s5 + $0x28] sm:$0xff] }
   0x3   :  { %v245_v7 = vpack.c.bf16 %v29_v5, %v28_v2 }
   0x4   :  { %243 = vmatpush3.bf16.msra.mxu0 %v242_v4 }
   0x5   :  { %244 = vmatprep.subr.bf16.mxu0 %v303_v3 }
   0x6   :  { %11 = vsyncpa [#allocation3], 0  ;;  %v248_v10 = vpack.c.bf16 %v31_v9, %v30_v8  ;;  %v32_v11 = vld [vmem:[%s426_s5 + $0x30] sm:$0xff]  ;;  %v33_v12 = vld [vmem:[%s426_s5 + $0x38] sm:$0xff]  ;;  %v306_v28 = vmov 0   ;;  %vm112_vm1 = vcmask 64512   ;;  %v118_v36 = vlaneseq }
   0x7   :  { %v251_v13 = vpack.c.bf16 %v33_v12, %v32_v11  ;;  %v34_v14 = vld [vmem:[%s426_s5 + $0x40] sm:$0xff]  ;;  %v35_v15 = vld [vmem:[%s426_s5 + $0x48] sm:$0xff]  ;;  %v36_v17 = vld [vmem:[%s426_s5 + $0x50] sm:$0xff]  ;;  %272 = vset.pattern.permute.xlu0 %v306_v28  ;;  %vm160_vm6 = vcmask 7168  }
   0x8   :  { %246 = vmatpush3.bf16.msra.mxu0 %v245_v7  ;;  %v254_v16 = vpack.c.bf16 %v35_v15, %v34_v14  ;;  %v37_v18 = vld [vmem:[%s426_s5 + $0x58] sm:$0xff]  ;;  %v38_v20 = vld [vmem:[%s426_s5 + $0x60] sm:$0xff]  ;;  %v39_v21 = vld [vmem:[%s426_s5 + $0x68] sm:$0xff]  ;;  %v119_v37 = vshrl.u32 %v118_v36, 7 }
   0x9   :  { %247 = vmatprep.subr.bf16.mxu0 %v303_v3  ;;  %v257_v19 = vpack.c.bf16 %v37_v18, %v36_v17  ;;  %v260_v22 = vpack.c.bf16 %v39_v21, %v38_v20  ;;  %v40_v23 = vld [vmem:[%s426_s5 + $0x70] sm:$0xff]  ;;  %v41_v24 = vld [vmem:[%s426_s5 + $0x78] sm:$0xff]  ;;  %v24_v26 = vld [vmem:[%s425_s4] sm:$0xff] }
   0xa   :  { %v263_v25 = vpack.c.bf16 %v41_v24, %v40_v23  ;;  %v25_v27 = vmul.f32 14.285714, %v24_v26  ;;  %v128_v32 = vld [vmem:[%s421_s0] sm:$0xff] }
   0xb   :  { %v187_v38 = vld [vmem:[%s423_s2] ss:$0 sm:$0xff] }
   0xc   :  { %249 = vmatpush3.bf16.msra.mxu0 %v248_v10  ;;  %v188_v39 = vld [vmem:[%s422_s1] ss:$0 sm:$0xff]  ;;  %vm127_vm2 = vcmp.ne.s32.totalorder %v187_v38, %v119_v37  ;;  %s307_s1 = smov [#allocation2]  }
   0xd   :  { %250 = vmatprep.subr.bf16.mxu0 %v303_v3  ;;  %v151_v46 = vld [vmem:[%s424_s3] sm:$0xff]  ;;  %s179_s2 = sshll.u32 %s307_s1, 4  ;;  %s180_s2 = int_to_ptr.vmem [resolvable:$true] %s179_s2 }
   0xe   :  { %vm152_vm5 = vcmp.lt.f32.partialorder %v151_v46, 1e-06  ;;  %s279_s12 = scalar_lea.vmem %s180_s2, 128  ;;  %p284_p1 = scmp.lt.s32.totalorder %s180_s2, %s180_s2 }
   0xf   :  { %v153_v48 = vsel %vm152_vm5, 1.0, %v151_v46  ;;  %p280_p0 = scmp.ne.s32.totalorder %s180_s2, %s279_s12  ;;  %p285_p2 = scmp.lt.s32.totalorder %s279_s12, %s279_s12 }
  0x10   :  { %252 = vmatpush3.bf16.msra.mxu0 %v251_v13 }
  0x11   :  { %253 = vmatprep.subr.bf16.mxu0 %v303_v3  ;;  %p286_p3 = por %p285_p2, %p284_p1 }
  0x13   :  { %p287_p4 = pnand %p286_p3, %p280_p0 }
  0x14   :  { %255 = vmatpush3.bf16.msra.mxu0 %v254_v16 }
  0x15   :  { %256 = vmatprep.subr.bf16.mxu0 %v303_v3 }
  0x18   :  { %258 = vmatpush3.bf16.msra.mxu0 %v257_v19 }
  0x19   :  { %259 = vmatprep.subr.bf16.mxu0 %v303_v3 }
  0x1c   :  { %261 = vmatpush3.bf16.msra.mxu0 %v260_v22 }
  0x1d   :  { %262 = vmatprep.subr.bf16.mxu0 %v303_v3 }
  0x20   :  { %264 = vmatpush3.bf16.msra.mxu0 %v263_v25 }
  0x23   :  { %239 = vmatmul.mubr.f32.vlgmr.msra.gmra.mrb[0].mxu0 %v25_v27 }
  0xf6   :  { %v108_v29 = vpop.f32.mrb[0].mxu0 }
  0xf7   :  { %v240_v30 = vpop.f32.mrb[1].mxu0  ;;  %v113_v31 = vsel %vm112_vm1, %v108_v29, -inf }
  0xf8   :  { %114 = vmax.xlane.f32.xlu0 %v113_v31 }
 0x10e   :  { %131 = vperm.xlu0 %272, %v128_v32  }
 0x185   :  { %v115_v33 = vpop.xlane.xlu0 %114 }
 0x186   :  { %v116_v34 = vsub.f32 %v108_v29, %v115_v33 }
 0x188   :  { %v139_v35 = vmul.f32 1.442695, %v116_v34 }
 0x18a   :  { %273 = vpow2.f32 %v139_v35 }
 0x18d   :  { %v132_v40 = vpop.permute.xlu0 %131 }
 0x18e   :  { %vm137_vm3 = vcmp.eq.s32.totalorder %v132_v40, %v188_v39 }
 0x18f   :  { %vm138_vm4 = vmand %vm137_vm3, %vm127_vm2 }
 0x190   :  { %v147_v44 = vsel %vm138_vm4, %v116_v34, 0.0 }
 0x191   :  { %v148_v45 = vsel %vm112_vm1, %v147_v44, 0.0 }
 0x194   :  { %v274_v41 = vpop.eup %273 }
 0x195   :  { %v141_v42 = vsel %vm127_vm2, %v274_v41, 0.0 }
 0x196   :  { %v142_v43 = vsel %vm112_vm1, %v141_v42, 0.0 }
 0x197   :  { %143 = vadd.xlane.f32.xlu1 %v142_v43 }
 0x19b   :  { %149 = vadd.xlane.f32.xlu1 %v148_v45 }
 0x224   :  { %v144_v47 = vpop.xlane.xlu1 %143 }
 0x225   :  { %275 = vlog2.f32 %v144_v47 }
 0x226   :  { %277 = vrcp.f32 %v153_v48 }
 0x228   :  { %v150_v53 = vpop.xlane.xlu1 %149 }
 0x22f   :  { %v276_v49 = vpop.eup %275 }
 0x230   :  { %v146_v50 = vmul.f32 0.6931472, %v276_v49  ;;  %v278_v52 = vpop.eup %277 }
 0x232   :  { %v154_v51 = vmul.f32 %v151_v46, %v146_v50 }
 0x234   :  { %v155_v54 = vsub.f32 %v150_v53, %v154_v51 }
 0x236   :  { %v157_v55 = vmul.f32 %v278_v52, %v155_v54 }
 0x238   :  { %v161_v56 = vsel %vm160_vm6, %v157_v55, 0.0 }
 0x239   :  { %162 = vadd.xlane.f32.xlu1 %v161_v56 }
 0x2c6   :  { %v163_v57 = vpop.xlane.xlu1 %162 }
 0x2c7   :  { %v164_v58 = vrot.slane %v163_v57, 4 }
 0x2c9   :  { %v165_v59 = vadd.f32 %v164_v58, %v163_v57 }
 0x2cb   :  { %v166_v60 = vrot.slane %v165_v59, 2 }
 0x2cd   :  { %v167_v61 = vadd.f32 %v166_v60, %v165_v59 }
 0x2cf   :  { %v168_v62 = vrot.slane %v167_v61, 1 }
 0x2d1   :  { %v169_v63 = vadd.f32 %v168_v62, %v167_v61 }
 0x2d3   :  { %265 = vpush %v169_v63 }
 0x304   :  { %s266_s3 = spop %265 }
 0x305   :  { %v171_v0 = vstv %s266_s3 }
 0x306   :  { %172 = vst [vmem:[#allocation2] sm:$0xff] %v171_v0 }
 0x307   :  { %290 = shalt.err (!%p287_p4)
}
 0x308   :  { %s291_s15 = scalar_lea.hbm %s427_s6, 128 }
 0x309   :  { %p292_p5 = scmp.ne.s32.totalorder %s427_s6, %s291_s15  ;;  %p295_p6 = scmp.lt.u32.totalorder %s291_s15, %s427_s6 }
 0x30b   :  { %p297_p7 = pnand %p295_p6, %p292_p5 }
 0x30d   :  { %300 = shalt.err (!%p297_p7)
}
 0x30e   :  { %182 = dma.vmem_to_hbm [thread:$0]  %s180_s2, 128, %s427_s6, [#allocation3]  }
 0x30f   :  { %301 = dma.done.wait [#allocation3], 128  }
 0x310   :  { %302 = vsyncadd [#allocation3], 4294967168 }
 0x311   :  { %186 = vsyncpa [#allocation3], 1 }

// kernel: tpu_custom_call.1
= control target key start
LH: loop header
LB: loop body
LE: loop exit
PB: predicated region body
PF: predicated region fallthrough
CT: control target
= control target key end

     0   :  { %v303_v3 = vmov 0.0|0.0   ;;  %vm304_vm0 = vmmov 0   ;;  %v305_v6 = vmov 0.0   ;;  %s421_s0 = inlined_call_operand.vmem [shape: s32[8,1], index: 0, kind: input, shape index: {}]   ;;  %s422_s1 = inlined_call_operand.vmem [shape: s32[1,8], index: 1, kind: input, shape index: {}]   ;;  %s423_s2 = inlined_call_operand.vmem [shape: s32[1,8], index: 2, kind: input, shape index: {}]   ;;  %s424_s3 = inlined_call_operand.vmem [shape: f32[8,1], index: 3, kind: input, shape index: {}]   ;;  %s425_s4 = inlined_call_operand.vmem [shape: f32[8,128], index: 4, kind: input, shape index: {}]   ;;  %s426_s5 = inlined_call_operand.vmem [shape: f32[128,8], index: 5, kind: input, shape index: {}]   ;;  %s427_s6 = inlined_call_operand.hbm [shape: f32[1,8,128], index: 6, kind: output, shape index: {}]  }
   0x1   :  { %v26_v0 = vld [vmem:[%s426_s5] sm:$0xff]  ;;  %v27_v1 = vld [vmem:[%s426_s5 + $0x8] sm:$0xff]  ;;  %v28_v2 = vld [vmem:[%s426_s5 + $0x10] sm:$0xff]  ;;  %241 = vmatprep.subr.bf16.mxu0 %v303_v3  ;;  %238 = vmatprep.mubr.msk.f32.mxu0 %vm304_vm0, %v305_v6 }
   0x2   :  { %v242_v4 = vpack.c.bf16 %v27_v1, %v26_v0  ;;  %v29_v5 = vld [vmem:[%s426_s5 + $0x18] sm:$0xff]  ;;  %v30_v8 = vld [vmem:[%s426_s5 + $0x20] sm:$0xff]  ;;  %v31_v9 = vld [vmem:[%s426_s5 + $0x28] sm:$0xff] }
   0x3   :  { %v245_v7 = vpack.c.bf16 %v29_v5, %v28_v2 }
   0x4   :  { %243 = vmatpush3.bf16.msra.mxu0 %v242_v4 }
   0x5   :  { %244 = vmatprep.subr.bf16.mxu0 %v303_v3 }
   0x6   :  { %11 = vsyncpa [#allocation3], 0  ;;  %v248_v10 = vpack.c.bf16 %v31_v9, %v30_v8  ;;  %v32_v11 = vld [vmem:[%s426_s5 + $0x30] sm:$0xff]  ;;  %v33_v12 = vld [vmem:[%s426_s5 + $0x38] sm:$0xff]  ;;  %v306_v28 = vmov 0   ;;  %vm112_vm1 = vcmask 64512   ;;  %v118_v36 = vlaneseq }
   0x7   :  { %v251_v13 = vpack.c.bf16 %v33_v12, %v32_v11  ;;  %v34_v14 = vld [vmem:[%s426_s5 + $0x40] sm:$0xff]  ;;  %v35_v15 = vld [vmem:[%s426_s5 + $0x48] sm:$0xff]  ;;  %v36_v17 = vld [vmem:[%s426_s5 + $0x50] sm:$0xff]  ;;  %272 = vset.pattern.permute.xlu0 %v306_v28  ;;  %vm160_vm6 = vcmask 7168  }
   0x8   :  { %246 = vmatpush3.bf16.msra.mxu0 %v245_v7  ;;  %v254_v16 = vpack.c.bf16 %v35_v15, %v34_v14  ;;  %v37_v18 = vld [vmem:[%s426_s5 + $0x58] sm:$0xff]  ;;  %v38_v20 = vld [vmem:[%s426_s5 + $0x60] sm:$0xff]  ;;  %v39_v21 = vld [vmem:[%s426_s5 + $0x68] sm:$0xff]  ;;  %v119_v37 = vshrl.u32 %v118_v36, 7 }
   0x9   :  { %247 = vmatprep.subr.bf16.mxu0 %v303_v3  ;;  %v257_v19 = vpack.c.bf16 %v37_v18, %v36_v17  ;;  %v260_v22 = vpack.c.bf16 %v39_v21, %v38_v20  ;;  %v40_v23 = vld [vmem:[%s426_s5 + $0x70] sm:$0xff]  ;;  %v41_v24 = vld [vmem:[%s426_s5 + $0x78] sm:$0xff]  ;;  %v24_v26 = vld [vmem:[%s425_s4] sm:$0xff] }
   0xa   :  { %v263_v25 = vpack.c.bf16 %v41_v24, %v40_v23  ;;  %v25_v27 = vmul.f32 14.285714, %v24_v26  ;;  %v128_v32 = vld [vmem:[%s421_s0] sm:$0xff] }
   0xb   :  { %v187_v38 = vld [vmem:[%s423_s2] ss:$0 sm:$0xff] }
   0xc   :  { %249 = vmatpush3.bf16.msra.mxu0 %v248_v10  ;;  %v188_v39 = vld [vmem:[%s422_s1] ss:$0 sm:$0xff]  ;;  %vm127_vm2 = vcmp.ne.s32.totalorder %v187_v38, %v119_v37  ;;  %s307_s1 = smov [#allocation2]  }
   0xd   :  { %250 = vmatprep.subr.bf16.mxu0 %v303_v3  ;;  %v151_v46 = vld [vmem:[%s424_s3] sm:$0xff]  ;;  %s179_s2 = sshll.u32 %s307_s1, 4  ;;  %s180_s2 = int_to_ptr.vmem [resolvable:$true] %s179_s2 }
   0xe   :  { %vm152_vm5 = vcmp.lt.f32.partialorder %v151_v46, 1e-06  ;;  %s279_s12 = scalar_lea.vmem %s180_s2, 128  ;;  %p284_p1 = scmp.lt.s32.totalorder %s180_s2, %s180_s2 }
   0xf   :  { %v153_v48 = vsel %vm152_vm5, 1.0, %v151_v46  ;;  %p280_p0 = scmp.ne.s32.totalorder %s180_s2, %s279_s12  ;;  %p285_p2 = scmp.lt.s32.totalorder %s279_s12, %s279_s12 }
  0x10   :  { %252 = vmatpush3.bf16.msra.mxu0 %v251_v13 }
  0x11   :  { %253 = vmatprep.subr.bf16.mxu0 %v303_v3  ;;  %p286_p3 = por %p285_p2, %p284_p1 }
  0x13   :  { %p287_p4 = pnand %p286_p3, %p280_p0 }
  0x14   :  { %255 = vmatpush3.bf16.msra.mxu0 %v254_v16 }
  0x15   :  { %256 = vmatprep.subr.bf16.mxu0 %v303_v3 }
  0x18   :  { %258 = vmatpush3.bf16.msra.mxu0 %v257_v19 }
  0x19   :  { %259 = vmatprep.subr.bf16.mxu0 %v303_v3 }
  0x1c   :  { %261 = vmatpush3.bf16.msra.mxu0 %v260_v22 }
  0x1d   :  { %262 = vmatprep.subr.bf16.mxu0 %v303_v3 }
  0x20   :  { %264 = vmatpush3.bf16.msra.mxu0 %v263_v25 }
  0x23   :  { %239 = vmatmul.mubr.f32.vlgmr.msra.gmra.mrb[0].mxu0 %v25_v27 }
  0xf6   :  { %v108_v29 = vpop.f32.mrb[0].mxu0 }
  0xf7   :  { %v240_v30 = vpop.f32.mrb[1].mxu0  ;;  %v113_v31 = vsel %vm112_vm1, %v108_v29, -inf }
  0xf8   :  { %114 = vmax.xlane.f32.xlu0 %v113_v31 }
 0x10e   :  { %131 = vperm.xlu0 %272, %v128_v32  }
 0x185   :  { %v115_v33 = vpop.xlane.xlu0 %114 }
 0x186   :  { %v116_v34 = vsub.f32 %v108_v29, %v115_v33 }
 0x188   :  { %v139_v35 = vmul.f32 1.442695, %v116_v34 }
 0x18a   :  { %273 = vpow2.f32 %v139_v35 }
 0x18d   :  { %v132_v40 = vpop.permute.xlu0 %131 }
 0x18e   :  { %vm137_vm3 = vcmp.eq.s32.totalorder %v132_v40, %v188_v39 }
 0x18f   :  { %vm138_vm4 = vmand %vm137_vm3, %vm127_vm2 }
 0x190   :  { %v147_v44 = vsel %vm138_vm4, %v116_v34, 0.0 }
 0x191   :  { %v148_v45 = vsel %vm112_vm1, %v147_v44, 0.0 }
 0x194   :  { %v274_v41 = vpop.eup %273 }
 0x195   :  { %v141_v42 = vsel %vm127_vm2, %v274_v41, 0.0 }
 0x196   :  { %v142_v43 = vsel %vm112_vm1, %v141_v42, 0.0 }
 0x197   :  { %143 = vadd.xlane.f32.xlu1 %v142_v43 }
 0x19b   :  { %149 = vadd.xlane.f32.xlu1 %v148_v45 }
 0x224   :  { %v144_v47 = vpop.xlane.xlu1 %143 }
 0x225   :  { %275 = vlog2.f32 %v144_v47 }
 0x226   :  { %277 = vrcp.f32 %v153_v48 }
 0x228   :  { %v150_v53 = vpop.xlane.xlu1 %149 }
 0x22f   :  { %v276_v49 = vpop.eup %275 }
 0x230   :  { %v146_v50 = vmul.f32 0.6931472, %v276_v49  ;;  %v278_v52 = vpop.eup %277 }
 0x232   :  { %v154_v51 = vmul.f32 %v151_v46, %v146_v50 }
 0x234   :  { %v155_v54 = vsub.f32 %v150_v53, %v154_v51 }
 0x236   :  { %v157_v55 = vmul.f32 %v278_v52, %v155_v54 }
 0x238   :  { %v161_v56 = vsel %vm160_vm6, %v157_v55, 0.0 }
 0x239   :  { %162 = vadd.xlane.f32.xlu1 %v161_v56 }
 0x2c6   :  { %v163_v57 = vpop.xlane.xlu1 %162 }
 0x2c7   :  { %v164_v58 = vrot.slane %v163_v57, 4 }
 0x2c9   :  { %v165_v59 = vadd.f32 %v164_v58, %v163_v57 }
 0x2cb   :  { %v166_v60 = vrot.slane %v165_v59, 2 }
 0x2cd   :  { %v167_v61 = vadd.f32 %v166_v60, %v165_v59 }
 0x2cf   :  { %v168_v62 = vrot.slane %v167_v61, 1 }
 0x2d1   :  { %v169_v63 = vadd.f32 %v168_v62, %v167_v61 }
 0x2d3   :  { %265 = vpush %v169_v63 }
 0x304   :  { %s266_s3 = spop %265 }
 0x305   :  { %v171_v0 = vstv %s266_s3 }
 0x306   :  { %172 = vst [vmem:[#allocation2] sm:$0xff] %v171_v0 }
 0x307   :  { %290 = shalt.err (!%p287_p4)
}
 0x308   :  { %s291_s15 = scalar_lea.hbm %s427_s6, 128 }
 0x309   :  { %p292_p5 = scmp.ne.s32.totalorder %s427_s6, %s291_s15  ;;  %p295_p6 = scmp.lt.u32.totalorder %s291_s15, %s427_s6 }
 0x30b   :  { %p297_p7 = pnand %p295_p6, %p292_p5 }
 0x30d   :  { %300 = shalt.err (!%p297_p7)
}
 0x30e   :  { %182 = dma.vmem_to_hbm [thread:$0]  %s180_s2, 128, %s427_s6, [#allocation3]  }
 0x30f   :  { %301 = dma.done.wait [#allocation3], 128  }
 0x310   :  { %302 = vsyncadd [#allocation3], 4294967168 }
 0x311   :  { %186 = vsyncpa [#allocation3], 1 }

</bundles_post_ra>
